<compile_context>
chip_gen: v5e
topology: v5e:2x2
jax: 0.10.0
libtpu: 0.0.40
codegen_flags: <defaults>
</compile_context>

<pallas_src>
import functools

import jax
import jax.numpy as jnp
from jax import lax
from jax.experimental import pallas as pl
from jax.experimental.pallas import tpu as pltpu


_SENTINEL = 1.0e6   # invalid points are moved here (never inside any query radius)


def _round_up(x, m):
    return ((x + m - 1) // m) * m


def _cdiv(a, b):
    return (a + b - 1) // b


# ---------------------------------------------------------------------------
# Step 1: masked grid subsampling (plain-JAX glue).
# TODO(synk): the original masked_grid_subsampling CUDA/CPP op returns voxel
# barycenters; here we deterministically keep the first valid point per voxel.
# ---------------------------------------------------------------------------
def _grid_subsample(xyz, mask, npoint, sample_dl):
    def one(xyz_b, mask_b):
        big = jnp.iinfo(jnp.int32).max
        mins = jnp.min(jnp.where(mask_b[:, None], xyz_b, jnp.inf), axis=0)
        mins = jnp.where(jnp.isfinite(mins), mins, 0.0)          # fully-masked row guard
        vox = jnp.floor((xyz_b - mins) / sample_dl).astype(jnp.int32)
        vox = jnp.maximum(vox, 0)
        dims = jnp.max(jnp.where(mask_b[:, None], vox, 0), axis=0) + 1
        vid = (vox[:, 0] * dims[1] + vox[:, 1]) * dims[2] + vox[:, 2]
        vid = jnp.where(mask_b, vid, big)

        order = jnp.argsort(vid)                     # stable
        svid = vid[order]
        svalid = mask_b[order]
        first = jnp.concatenate([jnp.ones((1,), jnp.bool_), svid[1:] != svid[:-1]])
        first = first & svalid
        slot = jnp.cumsum(first.astype(jnp.int32)) - 1
        dst = jnp.where(first & (slot < npoint), slot, npoint)   # npoint -> dropped

        sel = jnp.zeros((npoint,), jnp.int32).at[dst].set(order.astype(jnp.int32), mode="drop")
        filled = jnp.zeros((npoint,), jnp.bool_).at[dst].set(True, mode="drop")
        sub_xyz = jnp.where(filled[:, None], xyz_b[sel], 0.0)
        return sub_xyz, filled

    return jax.vmap(one)(xyz, mask)


# ---------------------------------------------------------------------------
# Steps 2+3: masked ball query + grouped max pool, fused in one Pallas kernel.
#
# Grid = (B, C_tiles, Q_tiles, N_tiles); N is the reduction axis (last, "arbitrary"),
# B / C / Q tiles are "parallel" (megacore / v7x dual-TC friendly).
# ---------------------------------------------------------------------------
def _masked_max_pool_kernel(sxyz_ref, xyz_ref, feat_ref, out_ref, acc_ref, pen_ref,
                            *, radius2, n_valid, n_tile, lane_w, c_unroll, mask_tail):
    # sxyz_ref: (1, qt, 3)       query (subsampled) points for this q tile
    # xyz_ref : (1, 3, nt)       support points, channel-first; invalid -> _SENTINEL
    # feat_ref: (1, ct, nt)      features, channel-first (UNPADDED along N)
    # out_ref : (1, ct, qt)      pooled output (resident across the N grid axis)
    # acc_ref : (ct, qt, lane_w) lane-wide running-max accumulator (scratch)
    # pen_ref : (qt, nt)         additive ball-query penalty: 0 in-radius, -inf outside
    n_idx = pl.program_id(3)
    ct = acc_ref.shape[0]
    cdt = acc_ref.dtype
    neg = jnp.array(-jnp.inf, dtype=cdt)

    @pl.when(n_idx == 0)
    def _init():
        acc_ref[...] = jnp.full(acc_ref.shape, -jnp.inf, dtype=cdt)

    # Neighbourhood penalty for this (q tile, n tile): direct VPU diff^2, no MXU.
    # Computed once per grid step (shared by all ct channels).
    sq = sxyz_ref[0].astype(jnp.float32)          # (qt, 3)
    sp = xyz_ref[0].astype(jnp.float32)           # (3, nt)
    d0 = sq[:, 0:1] - sp[0:1, :]                  # (qt, nt)
    d1 = sq[:, 1:2] - sp[1:2, :]
    d2 = sq[:, 2:3] - sp[2:3, :]
    dist2 = d0 * d0 + d1 * d1 + d2 * d2           # (qt, nt), f32; never NaN -> pen never NaN
    pen_ref[...] = jnp.where(dist2 <= radius2, 0.0, -jnp.inf).astype(cdt)

    if mask_tail:
        # Column-validity mask for the ragged tail of the last (partial) N block:
        # out-of-bounds columns hold undefined data (possibly NaN), so they must be
        # removed with a select on the feature row, never via an additive -inf.
        col = lax.broadcasted_iota(jnp.int32, (1, n_tile), 1) + n_idx * n_tile
        col_ok = col < n_valid                    # (1, nt) bool
    else:
        col_ok = None

    n_groups = n_tile // lane_w

    def body(c, carry):
        # (1, nt) feature row; Mosaic loads it with a sublane-replicated layout so the
        # add below needs no materialized broadcast.
        frow = feat_ref[0, pl.ds(c, 1), :].astype(cdt)
        if col_ok is not None:
            frow = jnp.where(col_ok, frow, neg)   # tiny: nt/1024 vregs per channel
        # TODO(synk): masked_ordered_ball_query caps at the nsample nearest neighbors;
        # here we pool over ALL in-radius valid neighbors (identical when <= nsample).
        part = None
        for g in range(n_groups):                 # static; lane-group combine on VPU only
            lo = g * lane_w
            vals = pen_ref[:, pl.ds(lo, lane_w)] + frow[:, lo:lo + lane_w]   # (qt, lw)
            part = vals if part is None else jnp.maximum(part, vals)
        prev = acc_ref[pl.ds(c, 1), :, :]                                    # (1, qt, lw)
        acc_ref[pl.ds(c, 1), :, :] = jnp.maximum(prev, part[None])
        return carry

    lax.fori_loop(0, ct, body, 0, unroll=c_unroll)

    @pl.when(n_idx == pl.num_programs(3) - 1)
    def _finalize():
        # Single deferred cross-lane (XLU) max per channel, once per (b, c, q) tile.
        def fin(c, carry):
            row = jnp.max(acc_ref[pl.ds(c, 1), :, :], axis=-1)               # (1, qt)
            out_ref[0, pl.ds(c, 1), :] = row.astype(out_ref.dtype)
            return carry

        lax.fori_loop(0, ct, fin, 0, unroll=c_unroll)


def masked_max_pool_features(xyz, mask, sub_xyz, features, radius, *,
                             max_n_tile=2048, vmem_budget=20 * 1024 * 1024):
    B, N, _ = xyz.shape
    Q = sub_xyz.shape[1]
    C = features.shape[1]
    out_dtype = features.dtype
    # Hot-loop compute dtype: running max is exact, so bf16 features stay bf16.
    # TODO(synk): force float32 here on v5e (no bf16 VALU).
    cdt = jnp.bfloat16 if features.dtype == jnp.bfloat16 else jnp.float32

    # Validity mask folded into the support coords (sentinel never lands in a radius);
    # channel-first so the N axis is lane-dense in the kernel (small array, cheap).
    xyz_t = jnp.transpose(
        jnp.where(mask[:, :, None], xyz, _SENTINEL), (0, 2, 1)).astype(jnp.float32)

    # --- N tiling (reduction axis).  nt is a multiple of 128 (when N > 128), chosen
    #     near N, and never exceeds N; features/xyz are consumed UNPADDED and the
    #     ragged tail of the last tile is masked inside the kernel.
    if N <= 128:
        nt = N
    else:
        nt = _round_up(_cdiv(N, _cdiv(N, max_n_tile)), 128)
        nt = min(nt, 128 * (N // 128))
    num_n = _cdiv(N, nt)
    lane_w = 128 if nt >= 128 else nt
    mask_tail = (N % nt) != 0

    # --- Q padding: lane-dense output (multiple of 128) when npoint is large.
    qp = _round_up(Q, 128) if Q >= 128 else _round_up(Q, 8)
    sub_p = sub_xyz.astype(jnp.float32)
    if qp > Q:
        sub_p = jnp.pad(sub_p, ((0, 0), (0, qp - Q), (0, 0)))

    # --- C tiling: largest divisor of C that is <= 128 and a multiple of 8.
    ct = C
    for cand in (128, 64, 32, 16, 8):
        if C >= cand and C % cand == 0:
            ct = cand
            break
    num_c = C // ct

    # --- Q tiling: bound the deferred accumulator / penalty VMEM footprint (v7x has
    #     half the VMEM of v5e/v6e) and give v7x's second TensorCore work when
    #     B * num_c == 1.  Splitting Q only re-reads the (cheap, compute-bound)
    #     feature tiles; splitting C would re-pay the dist2 computation instead.
    cb = jnp.dtype(cdt).itemsize
    fb = jnp.dtype(features.dtype).itemsize

    def vmem_est(ct_, qt_, nt_):
        return (2 * ct_ * nt_ * fb            # feature tile (double-buffered)
                + 2 * ct_ * qt_ * fb          # output tile
                + qt_ * nt_ * cb              # penalty scratch
                + ct_ * qt_ * lane_w * cb     # lane-wide running-max accumulator
                + 2 * 3 * nt_ * 4 + 2 * qt_ * 3 * 4)

    qt, num_q = qp, 1
    while vmem_est(ct, qt, nt) > vmem_budget:
        if qt % 256 == 0:                     # keep q tiles lane-dense (>= 128)
            qt //= 2
            num_q *= 2
        elif ct % 2 == 0 and ct >= 16:        # ct stays a multiple of 8 dividing C
            ct //= 2
            num_c = C // ct
        elif nt % 256 == 0 and nt > lane_w:
            nt //= 2
            num_n = _cdiv(N, nt)
            mask_tail = (N % nt) != 0
        else:
            break
    if B * num_c * num_q < 2 and qt % 256 == 0:   # v7x: keep both TensorCores busy
        qt //= 2
        num_q *= 2

    grid = (B, num_c, num_q, num_n)
    kernel = functools.partial(
        _masked_max_pool_kernel,
        radius2=float(radius) * float(radius), n_valid=N, n_tile=nt, lane_w=lane_w,
        c_unroll=max(1, min(8, ct)), mask_tail=mask_tail)

    pooled = pl.pallas_call(
        kernel,
        out_shape=jax.ShapeDtypeStruct((B, C, qp), out_dtype),
        grid=grid,
        in_specs=[
            pl.BlockSpec((1, qt, 3), lambda b, c, q, n: (b, q, 0)),
            pl.BlockSpec((1, 3, nt), lambda b, c, q, n: (b, 0, n)),
            pl.BlockSpec((1, ct, nt), lambda b, c, q, n: (b, c, n)),
        ],
        out_specs=pl.BlockSpec((1, ct, qt), lambda b, c, q, n: (b, c, q)),
        scratch_shapes=[
            pltpu.VMEM((ct, qt, lane_w), cdt),   # deferred running-max accumulator
            pltpu.VMEM((qt, nt), cdt),           # additive ball-query penalty
        ],
        compiler_params=pltpu.CompilerParams(
            dimension_semantics=("parallel", "parallel", "parallel", "arbitrary"),
            vmem_limit_bytes=48 * 1024 * 1024),
    )(sub_p, xyz_t, features)

    pooled = pooled[:, :, :Q]
    # No-neighbour fallback (ball-query idx default 0): cheap O(B*C*Q) post-fix.
    pooled = jnp.where(pooled == -jnp.inf, features[:, :, 0:1].astype(out_dtype), pooled)
    return pooled


class MaxPoolDS:
    """JAX/Pallas port of pytorchpoints MaxPoolDS (wraps MaskedMaxPool). No learned params."""

    def __init__(self, npoint, radius, nsample, sampleDl):
        self.npoint = npoint
        self.radius = radius
        self.nsample = nsample
        self.sampleDl = sampleDl

    def __call__(self, xyz, mask, features):
        # xyz: (B, N, 3) f32, mask: (B, N) bool, features: (B, C, N)
        sub_xyz, sub_mask = _grid_subsample(xyz, mask, self.npoint, self.sampleDl)
        sub_features = masked_max_pool_features(xyz, mask, sub_xyz, features, self.radius)
        return sub_xyz, sub_mask, sub_features


# ---------------------------------------------------------------------------
# Pure-JAX reference for the fused kernel (same per-component distance math).
# ---------------------------------------------------------------------------
def _reference_pool(xyz, mask, sub_xyz, features, radius):
    diff = sub_xyz[:, :, None, :] - xyz[:, None, :, :]           # (B, Q, N, 3)
    dist2 = jnp.sum(diff * diff, axis=-1)                        # (B, Q, N)
    nbr = (dist2 <= float(radius) * float(radius)) & mask[:, None, :]
    has = jnp.any(nbr, axis=-1, keepdims=True)
    col0 = (jnp.arange(xyz.shape[1]) == 0)[None, None, :]
    nbr = jnp.where(has, nbr, col0)
    return jnp.max(
        jnp.where(nbr[:, None, :, :], features[:, :, None, :], -jnp.inf), axis=-1
    )


if __name__ == "__main__":
    key = jax.random.PRNGKey(0)

    def run_case(B, N, C, npoint, radius, nsample, sampleDl, dtype, case_key):
        k1, k2, k3 = jax.random.split(case_key, 3)
        xyz = jax.random.uniform(k1, (B, N, 3), dtype=jnp.float32)
        mask = jax.random.uniform(k2, (B, N), dtype=jnp.float32) > 0.1
        features = jax.random.normal(k3, (B, C, N), dtype=jnp.float32).astype(dtype)

        ds = MaxPoolDS(npoint, radius, nsample, sampleDl)
        sub_xyz, sub_mask, sub_features = ds(xyz, mask, features)
        jax.block_until_ready((sub_xyz, sub_mask, sub_features))

        assert sub_xyz.shape == (B, npoint, 3)
        assert sub_mask.shape == (B, npoint)
        assert sub_features.shape == (B, C, npoint)
        assert sub_features.dtype == dtype

        ref = _reference_pool(xyz, mask, sub_xyz, features.astype(jnp.float32), radius)
        got = sub_features.astype(jnp.float32)
        err = jnp.max(jnp.abs(got - ref))
        assert jnp.allclose(got, ref, atol=2e-3, rtol=2e-3), f"mismatch, max err {err}"

    k1, k2, k3 = jax.random.split(key, 3)
    # Small baseline case (single N tile, single group).
    run_case(B=2, N=64, C=8, npoint=16, radius=0.3, nsample=16, sampleDl=0.2,
             dtype=jnp.float32, case_key=k1)
    # N not a multiple of the tile: exercises the unpadded ragged-tail (column mask) path.
    run_case(B=1, N=200, C=16, npoint=32, radius=0.25, nsample=16, sampleDl=0.15,
             dtype=jnp.float32, case_key=k2)
    # bf16 feature path (bf16 hot loop / penalty / accumulator), multi lane-group.
    run_case(B=2, N=256, C=8, npoint=16, radius=0.3, nsample=16, sampleDl=0.2,
             dtype=jnp.bfloat16, case_key=k3)

    print("KERNEL_OK")
</pallas_src>

<mosaic_0001>
module attributes {stable_mosaic.version = 11 : i64} {
  func.func @_masked_max_pool_kernel(%arg0: i32, %arg1: i32, %arg2: i32, %arg3: i32, %arg4: memref<1x16x3xf32, #tpu.memory_space<vmem>>, %arg5: memref<1x3x64xf32, #tpu.memory_space<vmem>>, %arg6: memref<1x8x64xf32, #tpu.memory_space<vmem>>, %arg7: memref<1x8x16xf32, #tpu.memory_space<vmem>>, %arg8: memref<8x16x64xf32, #tpu.memory_space<vmem>>, %arg9: memref<16x64xf32, #tpu.memory_space<vmem>>) attributes {dimension_semantics = [#tpu.dimension_semantics<parallel>, #tpu.dimension_semantics<parallel>, #tpu.dimension_semantics<parallel>, #tpu.dimension_semantics<arbitrary>], iteration_bounds = array<i64: 2, 1, 1, 1>, scalar_prefetch = 0 : i64, scratch_operands = 2 : i64, tpu.core_type = #tpu.core_type<tc>, window_params = [{transform_indices = @transform_0, window_bounds = array<i64: 1, 16, 3>}, {transform_indices = @transform_1, window_bounds = array<i64: 1, 3, 64>}, {transform_indices = @transform_2, window_bounds = array<i64: 1, 8, 64>}, {transform_indices = @transform_3, window_bounds = array<i64: 1, 8, 16>}]} {
    %c0_i32 = arith.constant 0 : i32
    %0 = arith.cmpi eq, %arg3, %c0_i32 : i32
    %1 = arith.extui %0 : i1 to i32
    %c0_i32_0 = arith.constant 0 : i32
    %2 = arith.cmpi ne, %1, %c0_i32_0 : i32
    scf.if %2 {
      %cst_77 = arith.constant 0xFF800000 : f32
      %132 = vector.broadcast %cst_77 : f32 to vector<8x16x64xf32>
      %c0_78 = arith.constant 0 : index
      %c0_79 = arith.constant 0 : index
      %c0_80 = arith.constant 0 : index
      %133 = vector.load %arg8[%c0_78, %c0_79, %c0_80] : memref<8x16x64xf32, #tpu.memory_space<vmem>>, vector<8x16x64xf32>
      tpu.vector_store %arg8[%c0_78, %c0_79, %c0_80], %132 {strides = array<i32>} : memref<8x16x64xf32, #tpu.memory_space<vmem>>, vector<8x16x64xf32>,
    } else {
    }
    %c0 = arith.constant 0 : index
    %c0_1 = arith.constant 0 : index
    %c0_2 = arith.constant 0 : index
    %3 = vector.load %arg4[%c0, %c0_1, %c0_2] : memref<1x16x3xf32, #tpu.memory_space<vmem>>, vector<1x16x3xf32>
    %4 = vector.shape_cast %3 : vector<1x16x3xf32> to vector<16x3xf32>
    %c0_3 = arith.constant 0 : index
    %c0_4 = arith.constant 0 : index
    %c0_5 = arith.constant 0 : index
    %5 = vector.load %arg5[%c0_3, %c0_4, %c0_5] : memref<1x3x64xf32, #tpu.memory_space<vmem>>, vector<1x3x64xf32>
    %6 = vector.shape_cast %5 : vector<1x3x64xf32> to vector<3x64xf32>
    %7 = vector.extract_strided_slice %4 {offsets = [0, 0], sizes = [16, 1], strides = [1, 1]} : vector<16x3xf32> to vector<16x1xf32>
    %8 = vector.extract_strided_slice %6 {offsets = [0, 0], sizes = [1, 64], strides = [1, 1]} : vector<3x64xf32> to vector<1x64xf32>
    %9 = vector.broadcast %7 : vector<16x1xf32> to vector<16x64xf32>
    %10 = vector.broadcast %8 : vector<1x64xf32> to vector<16x64xf32>
    %11 = arith.subf %9, %10 : vector<16x64xf32>
    %12 = vector.extract_strided_slice %4 {offsets = [0, 1], sizes = [16, 1], strides = [1, 1]} : vector<16x3xf32> to vector<16x1xf32>
    %13 = vector.extract_strided_slice %6 {offsets = [1, 0], sizes = [1, 64], strides = [1, 1]} : vector<3x64xf32> to vector<1x64xf32>
    %14 = vector.broadcast %12 : vector<16x1xf32> to vector<16x64xf32>
    %15 = vector.broadcast %13 : vector<1x64xf32> to vector<16x64xf32>
    %16 = arith.subf %14, %15 : vector<16x64xf32>
    %17 = vector.extract_strided_slice %4 {offsets = [0, 2], sizes = [16, 1], strides = [1, 1]} : vector<16x3xf32> to vector<16x1xf32>
    %18 = vector.extract_strided_slice %6 {offsets = [2, 0], sizes = [1, 64], strides = [1, 1]} : vector<3x64xf32> to vector<1x64xf32>
    %19 = vector.broadcast %17 : vector<16x1xf32> to vector<16x64xf32>
    %20 = vector.broadcast %18 : vector<1x64xf32> to vector<16x64xf32>
    %21 = arith.subf %19, %20 : vector<16x64xf32>
    %22 = arith.mulf %11, %11 : vector<16x64xf32>
    %23 = arith.mulf %16, %16 : vector<16x64xf32>
    %24 = arith.addf %22, %23 : vector<16x64xf32>
    %25 = arith.mulf %21, %21 : vector<16x64xf32>
    %26 = arith.addf %24, %25 : vector<16x64xf32>
    %cst = arith.constant 9.000000e-02 : f32
    %27 = vector.broadcast %cst : f32 to vector<16x64xf32>
    %28 = arith.cmpf ole, %26, %27 : vector<16x64xf32>
    %cst_6 = arith.constant 0.000000e+00 : f32
    %cst_7 = arith.constant 0xFF800000 : f32
    %29 = vector.broadcast %cst_6 : f32 to vector<16x64xf32>
    %30 = vector.broadcast %cst_7 : f32 to vector<16x64xf32>
    %31 = arith.select %28, %29, %30 : vector<16x64xi1>, vector<16x64xf32>
    %c0_8 = arith.constant 0 : index
    %c0_9 = arith.constant 0 : index
    %32 = vector.load %arg9[%c0_8, %c0_9] : memref<16x64xf32, #tpu.memory_space<vmem>>, vector<16x64xf32>
    tpu.vector_store %arg9[%c0_8, %c0_9], %31 {strides = array<i32>} : memref<16x64xf32, #tpu.memory_space<vmem>>, vector<16x64xf32>,
    %c0_i32_10 = arith.constant 0 : i32
    %c0_11 = arith.constant 0 : index
    %33 = arith.index_cast %c0_i32_10 : i32 to index
    %c0_12 = arith.constant 0 : index
    %34 = vector.load %arg6[%c0_11, %33, %c0_12] : memref<1x8x64xf32, #tpu.memory_space<vmem>>, vector<1x1x64xf32>
    %35 = vector.shape_cast %34 : vector<1x1x64xf32> to vector<1x64xf32>
    %c0_13 = arith.constant 0 : index
    %c0_14 = arith.constant 0 : index
    %36 = vector.load %arg9[%c0_13, %c0_14] : memref<16x64xf32, #tpu.memory_space<vmem>>, vector<16x64xf32>
    %37 = vector.broadcast %35 : vector<1x64xf32> to vector<16x64xf32>
    %38 = arith.addf %36, %37 : vector<16x64xf32>
    %39 = arith.index_cast %c0_i32_10 : i32 to index
    %c0_15 = arith.constant 0 : index
    %c0_16 = arith.constant 0 : index
    %40 = vector.load %arg8[%39, %c0_15, %c0_16] : memref<8x16x64xf32, #tpu.memory_space<vmem>>, vector<1x16x64xf32>
    %41 = vector.shape_cast %38 : vector<16x64xf32> to vector<1x16x64xf32>
    %42 = arith.maximumf %40, %41 : vector<1x16x64xf32>
    %43 = arith.index_cast %c0_i32_10 : i32 to index
    %c0_17 = arith.constant 0 : index
    %c0_18 = arith.constant 0 : index
    %44 = vector.load %arg8[%43, %c0_17, %c0_18] : memref<8x16x64xf32, #tpu.memory_space<vmem>>, vector<1x16x64xf32>
    tpu.vector_store %arg8[%43, %c0_17, %c0_18], %42 {strides = array<i32>} : memref<8x16x64xf32, #tpu.memory_space<vmem>>, vector<1x16x64xf32>,
    %c1_i32 = arith.constant 1 : i32
    %c0_19 = arith.constant 0 : index
    %45 = arith.index_cast %c1_i32 : i32 to index
    %c0_20 = arith.constant 0 : index
    %46 = vector.load %arg6[%c0_19, %45, %c0_20] : memref<1x8x64xf32, #tpu.memory_space<vmem>>, vector<1x1x64xf32>
    %47 = vector.shape_cast %46 : vector<1x1x64xf32> to vector<1x64xf32>
    %c0_21 = arith.constant 0 : index
    %c0_22 = arith.constant 0 : index
    %48 = vector.load %arg9[%c0_21, %c0_22] : memref<16x64xf32, #tpu.memory_space<vmem>>, vector<16x64xf32>
    %49 = vector.broadcast %47 : vector<1x64xf32> to vector<16x64xf32>
    %50 = arith.addf %48, %49 : vector<16x64xf32>
    %51 = arith.index_cast %c1_i32 : i32 to index
    %c0_23 = arith.constant 0 : index
    %c0_24 = arith.constant 0 : index
    %52 = vector.load %arg8[%51, %c0_23, %c0_24] : memref<8x16x64xf32, #tpu.memory_space<vmem>>, vector<1x16x64xf32>
    %53 = vector.shape_cast %50 : vector<16x64xf32> to vector<1x16x64xf32>
    %54 = arith.maximumf %52, %53 : vector<1x16x64xf32>
    %55 = arith.index_cast %c1_i32 : i32 to index
    %c0_25 = arith.constant 0 : index
    %c0_26 = arith.constant 0 : index
    %56 = vector.load %arg8[%55, %c0_25, %c0_26] : memref<8x16x64xf32, #tpu.memory_space<vmem>>, vector<1x16x64xf32>
    tpu.vector_store %arg8[%55, %c0_25, %c0_26], %54 {strides = array<i32>} : memref<8x16x64xf32, #tpu.memory_space<vmem>>, vector<1x16x64xf32>,
    %c2_i32 = arith.constant 2 : i32
    %c0_27 = arith.constant 0 : index
    %57 = arith.index_cast %c2_i32 : i32 to index
    %c0_28 = arith.constant 0 : index
    %58 = vector.load %arg6[%c0_27, %57, %c0_28] : memref<1x8x64xf32, #tpu.memory_space<vmem>>, vector<1x1x64xf32>
    %59 = vector.shape_cast %58 : vector<1x1x64xf32> to vector<1x64xf32>
    %c0_29 = arith.constant 0 : index
    %c0_30 = arith.constant 0 : index
    %60 = vector.load %arg9[%c0_29, %c0_30] : memref<16x64xf32, #tpu.memory_space<vmem>>, vector<16x64xf32>
    %61 = vector.broadcast %59 : vector<1x64xf32> to vector<16x64xf32>
    %62 = arith.addf %60, %61 : vector<16x64xf32>
    %63 = arith.index_cast %c2_i32 : i32 to index
    %c0_31 = arith.constant 0 : index
    %c0_32 = arith.constant 0 : index
    %64 = vector.load %arg8[%63, %c0_31, %c0_32] : memref<8x16x64xf32, #tpu.memory_space<vmem>>, vector<1x16x64xf32>
    %65 = vector.shape_cast %62 : vector<16x64xf32> to vector<1x16x64xf32>
    %66 = arith.maximumf %64, %65 : vector<1x16x64xf32>
    %67 = arith.index_cast %c2_i32 : i32 to index
    %c0_33 = arith.constant 0 : index
    %c0_34 = arith.constant 0 : index
    %68 = vector.load %arg8[%67, %c0_33, %c0_34] : memref<8x16x64xf32, #tpu.memory_space<vmem>>, vector<1x16x64xf32>
    tpu.vector_store %arg8[%67, %c0_33, %c0_34], %66 {strides = array<i32>} : memref<8x16x64xf32, #tpu.memory_space<vmem>>, vector<1x16x64xf32>,
    %c3_i32 = arith.constant 3 : i32
    %c0_35 = arith.constant 0 : index
    %69 = arith.index_cast %c3_i32 : i32 to index
    %c0_36 = arith.constant 0 : index
    %70 = vector.load %arg6[%c0_35, %69, %c0_36] : memref<1x8x64xf32, #tpu.memory_space<vmem>>, vector<1x1x64xf32>
    %71 = vector.shape_cast %70 : vector<1x1x64xf32> to vector<1x64xf32>
    %c0_37 = arith.constant 0 : index
    %c0_38 = arith.constant 0 : index
    %72 = vector.load %arg9[%c0_37, %c0_38] : memref<16x64xf32, #tpu.memory_space<vmem>>, vector<16x64xf32>
    %73 = vector.broadcast %71 : vector<1x64xf32> to vector<16x64xf32>
    %74 = arith.addf %72, %73 : vector<16x64xf32>
    %75 = arith.index_cast %c3_i32 : i32 to index
    %c0_39 = arith.constant 0 : index
    %c0_40 = arith.constant 0 : index
    %76 = vector.load %arg8[%75, %c0_39, %c0_40] : memref<8x16x64xf32, #tpu.memory_space<vmem>>, vector<1x16x64xf32>
    %77 = vector.shape_cast %74 : vector<16x64xf32> to vector<1x16x64xf32>
    %78 = arith.maximumf %76, %77 : vector<1x16x64xf32>
    %79 = arith.index_cast %c3_i32 : i32 to index
    %c0_41 = arith.constant 0 : index
    %c0_42 = arith.constant 0 : index
    %80 = vector.load %arg8[%79, %c0_41, %c0_42] : memref<8x16x64xf32, #tpu.memory_space<vmem>>, vector<1x16x64xf32>
    tpu.vector_store %arg8[%79, %c0_41, %c0_42], %78 {strides = array<i32>} : memref<8x16x64xf32, #tpu.memory_space<vmem>>, vector<1x16x64xf32>,
    %c4_i32 = arith.constant 4 : i32
    %c0_43 = arith.constant 0 : index
    %81 = arith.index_cast %c4_i32 : i32 to index
    %c0_44 = arith.constant 0 : index
    %82 = vector.load %arg6[%c0_43, %81, %c0_44] : memref<1x8x64xf32, #tpu.memory_space<vmem>>, vector<1x1x64xf32>
    %83 = vector.shape_cast %82 : vector<1x1x64xf32> to vector<1x64xf32>
    %c0_45 = arith.constant 0 : index
    %c0_46 = arith.constant 0 : index
    %84 = vector.load %arg9[%c0_45, %c0_46] : memref<16x64xf32, #tpu.memory_space<vmem>>, vector<16x64xf32>
    %85 = vector.broadcast %83 : vector<1x64xf32> to vector<16x64xf32>
    %86 = arith.addf %84, %85 : vector<16x64xf32>
    %87 = arith.index_cast %c4_i32 : i32 to index
    %c0_47 = arith.constant 0 : index
    %c0_48 = arith.constant 0 : index
    %88 = vector.load %arg8[%87, %c0_47, %c0_48] : memref<8x16x64xf32, #tpu.memory_space<vmem>>, vector<1x16x64xf32>
    %89 = vector.shape_cast %86 : vector<16x64xf32> to vector<1x16x64xf32>
    %90 = arith.maximumf %88, %89 : vector<1x16x64xf32>
    %91 = arith.index_cast %c4_i32 : i32 to index
    %c0_49 = arith.constant 0 : index
    %c0_50 = arith.constant 0 : index
    %92 = vector.load %arg8[%91, %c0_49, %c0_50] : memref<8x16x64xf32, #tpu.memory_space<vmem>>, vector<1x16x64xf32>
    tpu.vector_store %arg8[%91, %c0_49, %c0_50], %90 {strides = array<i32>} : memref<8x16x64xf32, #tpu.memory_space<vmem>>, vector<1x16x64xf32>,
    %c5_i32 = arith.constant 5 : i32
    %c0_51 = arith.constant 0 : index
    %93 = arith.index_cast %c5_i32 : i32 to index
    %c0_52 = arith.constant 0 : index
    %94 = vector.load %arg6[%c0_51, %93, %c0_52] : memref<1x8x64xf32, #tpu.memory_space<vmem>>, vector<1x1x64xf32>
    %95 = vector.shape_cast %94 : vector<1x1x64xf32> to vector<1x64xf32>
    %c0_53 = arith.constant 0 : index
    %c0_54 = arith.constant 0 : index
    %96 = vector.load %arg9[%c0_53, %c0_54] : memref<16x64xf32, #tpu.memory_space<vmem>>, vector<16x64xf32>
    %97 = vector.broadcast %95 : vector<1x64xf32> to vector<16x64xf32>
    %98 = arith.addf %96, %97 : vector<16x64xf32>
    %99 = arith.index_cast %c5_i32 : i32 to index
    %c0_55 = arith.constant 0 : index
    %c0_56 = arith.constant 0 : index
    %100 = vector.load %arg8[%99, %c0_55, %c0_56] : memref<8x16x64xf32, #tpu.memory_space<vmem>>, vector<1x16x64xf32>
    %101 = vector.shape_cast %98 : vector<16x64xf32> to vector<1x16x64xf32>
    %102 = arith.maximumf %100, %101 : vector<1x16x64xf32>
    %103 = arith.index_cast %c5_i32 : i32 to index
    %c0_57 = arith.constant 0 : index
    %c0_58 = arith.constant 0 : index
    %104 = vector.load %arg8[%103, %c0_57, %c0_58] : memref<8x16x64xf32, #tpu.memory_space<vmem>>, vector<1x16x64xf32>
    tpu.vector_store %arg8[%103, %c0_57, %c0_58], %102 {strides = array<i32>} : memref<8x16x64xf32, #tpu.memory_space<vmem>>, vector<1x16x64xf32>,
    %c6_i32 = arith.constant 6 : i32
    %c0_59 = arith.constant 0 : index
    %105 = arith.index_cast %c6_i32 : i32 to index
    %c0_60 = arith.constant 0 : index
    %106 = vector.load %arg6[%c0_59, %105, %c0_60] : memref<1x8x64xf32, #tpu.memory_space<vmem>>, vector<1x1x64xf32>
    %107 = vector.shape_cast %106 : vector<1x1x64xf32> to vector<1x64xf32>
    %c0_61 = arith.constant 0 : index
    %c0_62 = arith.constant 0 : index
    %108 = vector.load %arg9[%c0_61, %c0_62] : memref<16x64xf32, #tpu.memory_space<vmem>>, vector<16x64xf32>
    %109 = vector.broadcast %107 : vector<1x64xf32> to vector<16x64xf32>
    %110 = arith.addf %108, %109 : vector<16x64xf32>
    %111 = arith.index_cast %c6_i32 : i32 to index
    %c0_63 = arith.constant 0 : index
    %c0_64 = arith.constant 0 : index
    %112 = vector.load %arg8[%111, %c0_63, %c0_64] : memref<8x16x64xf32, #tpu.memory_space<vmem>>, vector<1x16x64xf32>
    %113 = vector.shape_cast %110 : vector<16x64xf32> to vector<1x16x64xf32>
    %114 = arith.maximumf %112, %113 : vector<1x16x64xf32>
    %115 = arith.index_cast %c6_i32 : i32 to index
    %c0_65 = arith.constant 0 : index
    %c0_66 = arith.constant 0 : index
    %116 = vector.load %arg8[%115, %c0_65, %c0_66] : memref<8x16x64xf32, #tpu.memory_space<vmem>>, vector<1x16x64xf32>
    tpu.vector_store %arg8[%115, %c0_65, %c0_66], %114 {strides = array<i32>} : memref<8x16x64xf32, #tpu.memory_space<vmem>>, vector<1x16x64xf32>,
    %c7_i32 = arith.constant 7 : i32
    %c0_67 = arith.constant 0 : index
    %117 = arith.index_cast %c7_i32 : i32 to index
    %c0_68 = arith.constant 0 : index
    %118 = vector.load %arg6[%c0_67, %117, %c0_68] : memref<1x8x64xf32, #tpu.memory_space<vmem>>, vector<1x1x64xf32>
    %119 = vector.shape_cast %118 : vector<1x1x64xf32> to vector<1x64xf32>
    %c0_69 = arith.constant 0 : index
    %c0_70 = arith.constant 0 : index
    %120 = vector.load %arg9[%c0_69, %c0_70] : memref<16x64xf32, #tpu.memory_space<vmem>>, vector<16x64xf32>
    %121 = vector.broadcast %119 : vector<1x64xf32> to vector<16x64xf32>
    %122 = arith.addf %120, %121 : vector<16x64xf32>
    %123 = arith.index_cast %c7_i32 : i32 to index
    %c0_71 = arith.constant 0 : index
    %c0_72 = arith.constant 0 : index
    %124 = vector.load %arg8[%123, %c0_71, %c0_72] : memref<8x16x64xf32, #tpu.memory_space<vmem>>, vector<1x16x64xf32>
    %125 = vector.shape_cast %122 : vector<16x64xf32> to vector<1x16x64xf32>
    %126 = arith.maximumf %124, %125 : vector<1x16x64xf32>
    %127 = arith.index_cast %c7_i32 : i32 to index
    %c0_73 = arith.constant 0 : index
    %c0_74 = arith.constant 0 : index
    %128 = vector.load %arg8[%127, %c0_73, %c0_74] : memref<8x16x64xf32, #tpu.memory_space<vmem>>, vector<1x16x64xf32>
    tpu.vector_store %arg8[%127, %c0_73, %c0_74], %126 {strides = array<i32>} : memref<8x16x64xf32, #tpu.memory_space<vmem>>, vector<1x16x64xf32>,
    %c8_i32 = arith.constant 8 : i32
    %c0_i32_75 = arith.constant 0 : i32
    %129 = arith.cmpi eq, %arg3, %c0_i32_75 : i32
    %130 = arith.extui %129 : i1 to i32
    %c0_i32_76 = arith.constant 0 : i32
    %131 = arith.cmpi ne, %130, %c0_i32_76 : i32
    scf.if %131 {
      %c0_i32_77 = arith.constant 0 : i32
      %132 = arith.index_cast %c0_i32_77 : i32 to index
      %c0_78 = arith.constant 0 : index
      %c0_79 = arith.constant 0 : index
      %133 = vector.load %arg8[%132, %c0_78, %c0_79] : memref<8x16x64xf32, #tpu.memory_space<vmem>>, vector<1x16x64xf32>
      %cst_80 = arith.constant dense<0xFF800000> : vector<1x16xf32>
      %134 = vector.multi_reduction <maximumf>, %133, %cst_80 [2] : vector<1x16x64xf32> to vector<1x16xf32>
      %c0_81 = arith.constant 0 : index
      %135 = arith.index_cast %c0_i32_77 : i32 to index
      %c0_82 = arith.constant 0 : index
      %136 = vector.load %arg7[%c0_81, %135, %c0_82] : memref<1x8x16xf32, #tpu.memory_space<vmem>>, vector<1x1x16xf32>
      %137 = vector.shape_cast %136 : vector<1x1x16xf32> to vector<1x16xf32>
      %138 = vector.shape_cast %134 : vector<1x16xf32> to vector<1x1x16xf32>
      tpu.vector_store %arg7[%c0_81, %135, %c0_82], %138 {strides = array<i32>} : memref<1x8x16xf32, #tpu.memory_space<vmem>>, vector<1x1x16xf32>,
      %c1_i32_83 = arith.constant 1 : i32
      %139 = arith.index_cast %c1_i32_83 : i32 to index
      %c0_84 = arith.constant 0 : index
      %c0_85 = arith.constant 0 : index
      %140 = vector.load %arg8[%139, %c0_84, %c0_85] : memref<8x16x64xf32, #tpu.memory_space<vmem>>, vector<1x16x64xf32>
      %cst_86 = arith.constant dense<0xFF800000> : vector<1x16xf32>
      %141 = vector.multi_reduction <maximumf>, %140, %cst_86 [2] : vector<1x16x64xf32> to vector<1x16xf32>
      %c0_87 = arith.constant 0 : index
      %142 = arith.index_cast %c1_i32_83 : i32 to index
      %c0_88 = arith.constant 0 : index
      %143 = vector.load %arg7[%c0_87, %142, %c0_88] : memref<1x8x16xf32, #tpu.memory_space<vmem>>, vector<1x1x16xf32>
      %144 = vector.shape_cast %143 : vector<1x1x16xf32> to vector<1x16xf32>
      %145 = vector.shape_cast %141 : vector<1x16xf32> to vector<1x1x16xf32>
      tpu.vector_store %arg7[%c0_87, %142, %c0_88], %145 {strides = array<i32>} : memref<1x8x16xf32, #tpu.memory_space<vmem>>, vector<1x1x16xf32>,
      %c2_i32_89 = arith.constant 2 : i32
      %146 = arith.index_cast %c2_i32_89 : i32 to index
      %c0_90 = arith.constant 0 : index
      %c0_91 = arith.constant 0 : index
      %147 = vector.load %arg8[%146, %c0_90, %c0_91] : memref<8x16x64xf32, #tpu.memory_space<vmem>>, vector<1x16x64xf32>
      %cst_92 = arith.constant dense<0xFF800000> : vector<1x16xf32>
      %148 = vector.multi_reduction <maximumf>, %147, %cst_92 [2] : vector<1x16x64xf32> to vector<1x16xf32>
      %c0_93 = arith.constant 0 : index
      %149 = arith.index_cast %c2_i32_89 : i32 to index
      %c0_94 = arith.constant 0 : index
      %150 = vector.load %arg7[%c0_93, %149, %c0_94] : memref<1x8x16xf32, #tpu.memory_space<vmem>>, vector<1x1x16xf32>
      %151 = vector.shape_cast %150 : vector<1x1x16xf32> to vector<1x16xf32>
      %152 = vector.shape_cast %148 : vector<1x16xf32> to vector<1x1x16xf32>
      tpu.vector_store %arg7[%c0_93, %149, %c0_94], %152 {strides = array<i32>} : memref<1x8x16xf32, #tpu.memory_space<vmem>>, vector<1x1x16xf32>,
      %c3_i32_95 = arith.constant 3 : i32
      %153 = arith.index_cast %c3_i32_95 : i32 to index
      %c0_96 = arith.constant 0 : index
      %c0_97 = arith.constant 0 : index
      %154 = vector.load %arg8[%153, %c0_96, %c0_97] : memref<8x16x64xf32, #tpu.memory_space<vmem>>, vector<1x16x64xf32>
      %cst_98 = arith.constant dense<0xFF800000> : vector<1x16xf32>
      %155 = vector.multi_reduction <maximumf>, %154, %cst_98 [2] : vector<1x16x64xf32> to vector<1x16xf32>
      %c0_99 = arith.constant 0 : index
      %156 = arith.index_cast %c3_i32_95 : i32 to index
      %c0_100 = arith.constant 0 : index
      %157 = vector.load %arg7[%c0_99, %156, %c0_100] : memref<1x8x16xf32, #tpu.memory_space<vmem>>, vector<1x1x16xf32>
      %158 = vector.shape_cast %157 : vector<1x1x16xf32> to vector<1x16xf32>
      %159 = vector.shape_cast %155 : vector<1x16xf32> to vector<1x1x16xf32>
      tpu.vector_store %arg7[%c0_99, %156, %c0_100], %159 {strides = array<i32>} : memref<1x8x16xf32, #tpu.memory_space<vmem>>, vector<1x1x16xf32>,
      %c4_i32_101 = arith.constant 4 : i32
      %160 = arith.index_cast %c4_i32_101 : i32 to index
      %c0_102 = arith.constant 0 : index
      %c0_103 = arith.constant 0 : index
      %161 = vector.load %arg8[%160, %c0_102, %c0_103] : memref<8x16x64xf32, #tpu.memory_space<vmem>>, vector<1x16x64xf32>
      %cst_104 = arith.constant dense<0xFF800000> : vector<1x16xf32>
      %162 = vector.multi_reduction <maximumf>, %161, %cst_104 [2] : vector<1x16x64xf32> to vector<1x16xf32>
      %c0_105 = arith.constant 0 : index
      %163 = arith.index_cast %c4_i32_101 : i32 to index
      %c0_106 = arith.constant 0 : index
      %164 = vector.load %arg7[%c0_105, %163, %c0_106] : memref<1x8x16xf32, #tpu.memory_space<vmem>>, vector<1x1x16xf32>
      %165 = vector.shape_cast %164 : vector<1x1x16xf32> to vector<1x16xf32>
      %166 = vector.shape_cast %162 : vector<1x16xf32> to vector<1x1x16xf32>
      tpu.vector_store %arg7[%c0_105, %163, %c0_106], %166 {strides = array<i32>} : memref<1x8x16xf32, #tpu.memory_space<vmem>>, vector<1x1x16xf32>,
      %c5_i32_107 = arith.constant 5 : i32
      %167 = arith.index_cast %c5_i32_107 : i32 to index
      %c0_108 = arith.constant 0 : index
      %c0_109 = arith.constant 0 : index
      %168 = vector.load %arg8[%167, %c0_108, %c0_109] : memref<8x16x64xf32, #tpu.memory_space<vmem>>, vector<1x16x64xf32>
      %cst_110 = arith.constant dense<0xFF800000> : vector<1x16xf32>
      %169 = vector.multi_reduction <maximumf>, %168, %cst_110 [2] : vector<1x16x64xf32> to vector<1x16xf32>
      %c0_111 = arith.constant 0 : index
      %170 = arith.index_cast %c5_i32_107 : i32 to index
      %c0_112 = arith.constant 0 : index
      %171 = vector.load %arg7[%c0_111, %170, %c0_112] : memref<1x8x16xf32, #tpu.memory_space<vmem>>, vector<1x1x16xf32>
      %172 = vector.shape_cast %171 : vector<1x1x16xf32> to vector<1x16xf32>
      %173 = vector.shape_cast %169 : vector<1x16xf32> to vector<1x1x16xf32>
      tpu.vector_store %arg7[%c0_111, %170, %c0_112], %173 {strides = array<i32>} : memref<1x8x16xf32, #tpu.memory_space<vmem>>, vector<1x1x16xf32>,
      %c6_i32_113 = arith.constant 6 : i32
      %174 = arith.index_cast %c6_i32_113 : i32 to index
      %c0_114 = arith.constant 0 : index
      %c0_115 = arith.constant 0 : index
      %175 = vector.load %arg8[%174, %c0_114, %c0_115] : memref<8x16x64xf32, #tpu.memory_space<vmem>>, vector<1x16x64xf32>
      %cst_116 = arith.constant dense<0xFF800000> : vector<1x16xf32>
      %176 = vector.multi_reduction <maximumf>, %175, %cst_116 [2] : vector<1x16x64xf32> to vector<1x16xf32>
      %c0_117 = arith.constant 0 : index
      %177 = arith.index_cast %c6_i32_113 : i32 to index
      %c0_118 = arith.constant 0 : index
      %178 = vector.load %arg7[%c0_117, %177, %c0_118] : memref<1x8x16xf32, #tpu.memory_space<vmem>>, vector<1x1x16xf32>
      %179 = vector.shape_cast %178 : vector<1x1x16xf32> to vector<1x16xf32>
      %180 = vector.shape_cast %176 : vector<1x16xf32> to vector<1x1x16xf32>
      tpu.vector_store %arg7[%c0_117, %177, %c0_118], %180 {strides = array<i32>} : memref<1x8x16xf32, #tpu.memory_space<vmem>>, vector<1x1x16xf32>,
      %c7_i32_119 = arith.constant 7 : i32
      %181 = arith.index_cast %c7_i32_119 : i32 to index
      %c0_120 = arith.constant 0 : index
      %c0_121 = arith.constant 0 : index
      %182 = vector.load %arg8[%181, %c0_120, %c0_121] : memref<8x16x64xf32, #tpu.memory_space<vmem>>, vector<1x16x64xf32>
      %cst_122 = arith.constant dense<0xFF800000> : vector<1x16xf32>
      %183 = vector.multi_reduction <maximumf>, %182, %cst_122 [2] : vector<1x16x64xf32> to vector<1x16xf32>
      %c0_123 = arith.constant 0 : index
      %184 = arith.index_cast %c7_i32_119 : i32 to index
      %c0_124 = arith.constant 0 : index
      %185 = vector.load %arg7[%c0_123, %184, %c0_124] : memref<1x8x16xf32, #tpu.memory_space<vmem>>, vector<1x1x16xf32>
      %186 = vector.shape_cast %185 : vector<1x1x16xf32> to vector<1x16xf32>
      %187 = vector.shape_cast %183 : vector<1x16xf32> to vector<1x1x16xf32>
      tpu.vector_store %arg7[%c0_123, %184, %c0_124], %187 {strides = array<i32>} : memref<1x8x16xf32, #tpu.memory_space<vmem>>, vector<1x1x16xf32>,
      %c8_i32_125 = arith.constant 8 : i32
    } else {
    }
    return
  }
  func.func @transform_0(%arg0: i32, %arg1: i32, %arg2: i32, %arg3: i32) -> (i32, i32, i32) {
    %c0_i32 = arith.constant 0 : i32
    %c0_i32_0 = arith.constant 0 : i32
    return %arg0, %arg2, %c0_i32 : i32, i32, i32
  }
  func.func @transform_1(%arg0: i32, %arg1: i32, %arg2: i32, %arg3: i32) -> (i32, i32, i32) {
    %c0_i32 = arith.constant 0 : i32
    %c0_i32_0 = arith.constant 0 : i32
    return %arg0, %c0_i32, %arg3 : i32, i32, i32
  }
  func.func @transform_2(%arg0: i32, %arg1: i32, %arg2: i32, %arg3: i32) -> (i32, i32, i32) {
    %c0_i32 = arith.constant 0 : i32
    return %arg0, %arg1, %arg3 : i32, i32, i32
  }
  func.func @transform_3(%arg0: i32, %arg1: i32, %arg2: i32, %arg3: i32) -> (i32, i32, i32) {
    %c0_i32 = arith.constant 0 : i32
    return %arg0, %arg1, %arg2 : i32, i32, i32
  }
}

</mosaic_0001>

<bundles_post_ra>
// kernel: tpu_custom_call.1
= control target key start
LH: loop header
LB: loop body
LE: loop exit
PB: predicated region body
PF: predicated region fallthrough
CT: control target
= control target key end

     0   :  { %8 = vsyncpa [#allocation5], 0  ;;  %s1110_s0 = inlined_call_operand.vmem [shape: f32[2,16,3], index: 0, kind: input, shape index: {}]   ;;  %s1111_s1 = inlined_call_operand.vmem [shape: f32[2,3,64], index: 1, kind: input, shape index: {}]   ;;  %s1112_s2 = inlined_call_operand.vmem [shape: f32[2,8,64], index: 2, kind: input, shape index: {}]   ;;  %s1113_s3 = inlined_call_operand.hbm [shape: f32[2,8,16], index: 3, kind: output, shape index: {}]  }
   0x1   :  { %10 = vsyncpa [#allocation5 + $0x1], 0  ;;  %s911_s12 = smov 0   ;;  %s913_s13 = smov 0  }
   0x2   :  { %s915_s14 = smov 0   ;;  %s917_s15 = smov 0  }
   0x3   :  { %s919_s16 = smov 0   ;;  %s921_s17 = smov 0  }
   0x4 LB: > { %s721_s18 = sadd.s32 4294967295, %s885_s17   ;;  %s722_s19 = sadd.s32 4294967294, %s885_s17   ;;  %s885_s17 = sphi %s921_s17, %s16_s17   ;;  %s881_s16 = sphi %s919_s16, %s1120_s16   ;;  %s877_s15 = sphi %s917_s15, %s1119_s15   ;;  %s873_s14 = sphi %s915_s14, %s1118_s14   ;;  %s869_s13 = sphi %s913_s13, %s1117_s13   ;;  %s865_s12 = sphi %s911_s12, %s1116_s12  }
   0x5   : > { %s42_s20 = sadd.s32 1, %s881_s16  ;;  %s139_s21 = sadd.s32 1, %s873_s14 }
   0x6   : > { %p44_p0 = scmp.ge.s32.totalorder %s42_s20, 2  ;;  %p149_p1 = scmp.ne.s32.totalorder %s873_s14, %s869_s13 }
   0x7   : > { %p150_p2 = scmp.eq.s32.totalorder %s721_s18, 1  ;;  %p155_p3 = scmp.ne.s32.totalorder %s869_s13, %s865_s12 }
   0x8   : > { %s1122_s20 = smov (%p44_p0, %s42_s20), 0  ;;  %p156_p5 = scmp.eq.s32.totalorder %s722_s19, 1 }
   0x9   : > { %p951_p4 = por %p150_p2, %p149_p1  ;;  %s132_s23 = ssub.s32 %s881_s16, %s1122_s20 }
   0xa   : > { %p725_p6 = scmp.ge.s32.totalorder %s885_s17, 1  ;;  %p137_p7 = scmp.eq.s32.totalorder %s132_s23, 0 }
   0xb   : > { %p958_p8 = por %p156_p5, %p155_p3  ;;  %p210_p9 = scmp.lt.s32.totalorder %s885_s17, 3 }
   0xc   : > { %s964_s25 = scalar_select %p137_p7, %s873_s14, %s139_s21  }
   0xd   : > { %p211_p10 = pnand %p725_p6, %p210_p9 }
   0xe   : > { %p256_p11 = scmp.lt.s32.totalorder (!%p211_p10), %s877_s15, 1  ;;  %s252_s18 = sand.u32 (!%p211_p10), 1, %s869_s13  }
   0xf   : > { %214 = sbr.rel (%p211_p10) target bundleno = 334 (0x14e), region = 32  ;;  %s726_s19 = sshll.u32 (!%p211_p10), %s252_s18, 3 }
  0x10   : > { %s1046_s21 = scalar_lea.vmem (!%p211_p10), [#allocation4], %s726_s19  ;;  %s732_s23 = sshll.u32 (!%p211_p10), %s877_s15, 3 }
  0x11   : > { %s604_s29 = sshll.u32 (!%p211_p10), %s1046_s21, 4  ;;  %s605_s29 = int_to_ptr.vmem [resolvable:$true] %s604_s29 }
  0x14   : > { %v887_v0 = vmov 1   ;;  %v888_v1 = vmov 0   ;;  %s968_s26 = scalar_select %p256_p11, %s877_s15, 1  ;;  %v889_v2 = vmov 2   ;;  %vm286_vm0 = vcmask 523264  }
  0x15   : > { %796 = vset.pattern.permute.xlu1 %v887_v0  ;;  %795 = vset.pattern.permute.xlu0 %v888_v1  ;;  %v890_v5 = vmov -inf   ;;  %vm479_vm3 = vcmask 130112   ;;  %vm482_vm4 = vcmask 122880   ;;  %s590_s15 = scalar_lea.sflag [#allocation5], %s252_s18 }
  0x16   : > { %797 = vset.pattern.permute.xlu2 %v889_v2  ;;  %s735_s27 = sshll.u32 %s968_s26, 4  ;;  %s730_s28 = sshll.u32 %s968_s26, 3  ;;  %287 = vst.msk [vmem:[#allocation2] sm:$0xff] %vm286_vm0, %v890_v5 }
  0x17   : > { %s263_s4 = scalar_lea.vmem %s1110_s0, %s735_s27  ;;  %s978_s7 = scalar_lea.vmem %s1112_s2, %s730_s28  ;;  %288 = vst.msk [vmem:[#allocation2 + $0x8] sm:$0xff] %vm286_vm0, %v890_v5 }
  0x18   : > { %v303_v3 = vld [vmem:[%s263_s4] sm:$0xff]  ;;  %v304_v4 = vld [vmem:[%s263_s4 + $0x8] sm:$0xff]  ;;  %289 = vst.msk [vmem:[#allocation2 + $0x10] sm:$0xff] %vm286_vm0, %v890_v5  ;;  %s729_s8 = sshll.u32 %s968_s26, 2  ;;  %s602_s28 = scalar_lea.hbm %s1113_s3, %s732_s23 }
  0x19   : > { %320 = vperm.xlu1 %796, %v303_v3   ;;  %308 = vperm.xlu0 %795, %v303_v3   ;;  %290 = vst.msk [vmem:[#allocation2 + $0x18] sm:$0xff] %vm286_vm0, %v890_v5  ;;  %s271_s11 = scalar_lea.vmem %s1111_s1, %s729_s8  ;;  %v799_v32 = vld [vmem:[%s978_s7] ss:$0 sm:$0xff]  ;;  %v800_v33 = vld [vmem:[%s978_s7 + $0x1] ss:$0 sm:$0xff]  ;;  %s606_s30 = sshll.u32 %s602_s28, 4  ;;  %s607_s30 = int_to_ptr.hbm [resolvable:$true] %s606_s30 }
  0x1a   : > { %331 = vperm.xlu2 %797, %v303_v3   ;;  %291 = vst.msk [vmem:[#allocation2 + $0x20] sm:$0xff] %vm286_vm0, %v890_v5  ;;  %v305_v6 = vld [vmem:[%s271_s11] sm:$0x7]  ;;  %v802_v35 = vld [vmem:[%s978_s7 + $0x3] ss:$0 sm:$0xff]  ;;  %s821_s4 = sshra.s32 %s607_s30, 4  ;;  %s822_s4 = int_to_ptr.hbm [resolvable:$true] %s821_s4 }
  0x1b   : > { %292 = vst.msk [vmem:[#allocation2 + $0x28] sm:$0xff] %vm286_vm0, %v890_v5  ;;  %v338_v7 = vperm.slane %v305_v6, 2  ;;  %v327_v9 = vperm.slane %v305_v6, 1  ;;  %v316_v10 = vperm.slane %v305_v6, 0  ;;  %v801_v34 = vld [vmem:[%s978_s7 + $0x2] ss:$0 sm:$0xff]  ;;  %p828_p1 = scmp.lt.s32.totalorder %s822_s4, %s1113_s3 }
  0x1c   : > { %293 = vst.msk [vmem:[#allocation2 + $0x30] sm:$0xff] %vm286_vm0, %v890_v5  ;;  %v803_v37 = vld [vmem:[%s978_s7 + $0x4] ss:$0 sm:$0xff]  ;;  %v804_v38 = vld [vmem:[%s978_s7 + $0x5] ss:$0 sm:$0xff]  ;;  %s823_s5 = scalar_lea.hbm %s822_s4, 8 }
  0x1d   : > { %294 = vst.msk [vmem:[#allocation2 + $0x38] sm:$0xff] %vm286_vm0, %v890_v5  ;;  %v805_v39 = vld [vmem:[%s978_s7 + $0x6] ss:$0 sm:$0xff]  ;;  %v806_v40 = vld [vmem:[%s978_s7 + $0x7] ss:$0 sm:$0xff]  ;;  %p824_p12 = scmp.ne.s32.totalorder %s822_s4, %s823_s5  ;;  %s827_s8 = scalar_lea.hbm %s1113_s3, 16 }
  0x1e   : > { %295 = vst.msk [vmem:[#allocation2 + $0x40] sm:$0xff] %vm286_vm0, %v890_v5  ;;  %v364_v44 = vld [vmem:[#allocation2] sm:$0xff]  ;;  %p829_p2 = scmp.lt.s32.totalorder %s827_s8, %s823_s5 }
  0x1f   : > { %296 = vst.msk [vmem:[#allocation2 + $0x48] sm:$0xff] %vm286_vm0, %v890_v5  ;;  %v377_v41 = vld [vmem:[#allocation2 + $0x10] sm:$0xff]  ;;  %p825_p13 = pnand %p824_p12, %p951_p4 }
  0x20   : > { %297 = vst.msk [vmem:[#allocation2 + $0x50] sm:$0xff] %vm286_vm0, %v890_v5  ;;  %v378_v1 = vld [vmem:[#allocation2 + $0x18] sm:$0xff]  ;;  %p830_p3 = por %p829_p2, %p828_p1 }
  0x21   : > { %324 = vperm.xlu1 %796, %v304_v4   ;;  %313 = vperm.xlu0 %795, %v304_v4   ;;  %298 = vst.msk [vmem:[#allocation2 + $0x58] sm:$0xff] %vm286_vm0, %v890_v5  ;;  %v390_v45 = vld [vmem:[#allocation2 + $0x20] sm:$0xff]  ;;  %p826_p0 = pneg %p825_p13 }
  0x22   : > { %335 = vperm.xlu2 %797, %v304_v4   ;;  %299 = vst.msk [vmem:[#allocation2 + $0x60] sm:$0xff] %vm286_vm0, %v890_v5  ;;  %v365_v4 = vld [vmem:[#allocation2 + $0x8] sm:$0xff] }
  0x23   : > { %300 = vst.msk [vmem:[#allocation2 + $0x68] sm:$0xff] %vm286_vm0, %v890_v5  ;;  %v403_v50 = vld [vmem:[#allocation2 + $0x30] sm:$0xff]  ;;  %p831_p5 = pnand %p830_p3, %p826_p0 }
  0x24   : > { %301 = vst.msk [vmem:[#allocation2 + $0x70] sm:$0xff] %vm286_vm0, %v890_v5 }
  0x25   : > { %302 = vst.msk [vmem:[#allocation2 + $0x78] sm:$0xff] %vm286_vm0, %v890_v5  ;;  %v416_v57 = vld [vmem:[#allocation2 + $0x40] sm:$0xff] }
  0x27   : > { %v429_v52 = vld [vmem:[#allocation2 + $0x50] sm:$0xff] }
  0x29   : > { %798 = vset.pattern.permute.xlu0 %v889_v2  ;;  %v442_v60 = vld [vmem:[#allocation2 + $0x60] sm:$0xff] }
  0x2b   : > { %v455_v63 = vld [vmem:[#allocation2 + $0x70] sm:$0xff] }
  0x74   : > { %v332_v8 = vpop.permute.xlu2 %331 }
  0x75   : > { %v339_v11 = vsub.f32 %v332_v8, %v338_v7 }
  0x77   : > { %v347_v16 = vmul.f32 %v339_v11, %v339_v11  ;;  %v391_v11 = vld [vmem:[#allocation2 + $0x28] sm:$0xff] }
  0x7c   : > { %v336_v20 = vpop.permute.xlu2 %335 }
  0x7d   : > { %v340_v24 = vsub.f32 %v336_v20, %v338_v7 }
  0x7f   : > { %v348_v30 = vmul.f32 %v340_v24, %v340_v24 }
  0x8b   : > { %v321_v12 = vpop.permute.xlu1 %320  ;;  %v309_v13 = vpop.permute.xlu0 %308 }
  0x8c   : > { %v328_v14 = vsub.f32 %v321_v12, %v327_v9  ;;  %v317_v15 = vsub.f32 %v309_v13, %v316_v10  ;;  %v417_v13 = vld [vmem:[#allocation2 + $0x48] sm:$0xff] }
  0x8e   : > { %v343_v17 = vmul.f32 %v328_v14, %v328_v14  ;;  %v341_v18 = vmul.f32 %v317_v15, %v317_v15 }
  0x90   : > { %v345_v19 = vadd.f32 %v343_v17, %v341_v18  ;;  %v443_v18 = vld [vmem:[#allocation2 + $0x68] sm:$0xff] }
  0x92   : > { %v349_v21 = vadd.f32 %v347_v16, %v345_v19 }
  0x93   : > { %v325_v22 = vpop.permute.xlu1 %324  ;;  %v314_v23 = vpop.permute.xlu0 %313 }
  0x94   : > { %vm351_vm1 = vcmp.le.f32.partialorder %v349_v21, 0.09  ;;  %v329_v25 = vsub.f32 %v325_v22, %v327_v9  ;;  %v318_v26 = vsub.f32 %v314_v23, %v316_v10  ;;  %v430_v22 = vld [vmem:[#allocation2 + $0x58] sm:$0xff] }
  0x95   : > { %v353_v27 = vsel %vm351_vm1, 0.0, %v890_v5 }
  0x96   : > { %356 = vst.msk [vmem:[#allocation3] sm:$0xff] %vm286_vm0, %v353_v27  ;;  %v344_v28 = vmul.f32 %v329_v25, %v329_v25  ;;  %v342_v29 = vmul.f32 %v318_v26, %v318_v26  ;;  %v456_v27 = vld [vmem:[#allocation2 + $0x78] sm:$0xff] }
  0x98   : > { %v346_v31 = vadd.f32 %v344_v28, %v342_v29 }
  0x9a   : > { %v350_v36 = vadd.f32 %v348_v30, %v346_v31 }
  0x9c   : > { %vm352_vm2 = vcmp.le.f32.partialorder %v350_v36, 0.09 }
  0x9d   : > { %v359_v42 = vld [vmem:[#allocation3] sm:$0xff]  ;;  %v354_v43 = vsel %vm352_vm2, 0.0, %v890_v5  ;;  %v404_v5 = vld [vmem:[#allocation2 + $0x38] sm:$0xff] }
  0x9e   : > { %357 = vst.msk [vmem:[#allocation3 + $0x8] sm:$0xff] %vm286_vm0, %v354_v43  ;;  %v374_v46 = vadd.f32 %v800_v33, %v359_v42  ;;  %v362_v47 = vadd.f32 %v799_v32, %v359_v42  ;;  %v387_v48 = vadd.f32 %v801_v34, %v359_v42  ;;  %v400_v49 = vadd.f32 %v802_v35, %v359_v42 }
  0x9f   : > { %v426_v51 = vadd.f32 %v804_v38, %v359_v42  ;;  %v413_v53 = vadd.f32 %v803_v37, %v359_v42  ;;  %v439_v58 = vadd.f32 %v805_v39, %v359_v42  ;;  %v452_v61 = vadd.f32 %v806_v40, %v359_v42 }
  0xa0   : > { %v379_v54 = vmax.f32 %v377_v41, %v374_v46  ;;  %v366_v55 = vmax.f32 %v364_v44, %v362_v47  ;;  %v392_v56 = vmax.f32 %v390_v45, %v387_v48  ;;  %v405_v59 = vmax.f32 %v403_v50, %v400_v49 }
  0xa1   : > { %v431_v62 = vmax.f32 %v429_v52, %v426_v51  ;;  %v418_v0 = vmax.f32 %v416_v57, %v413_v53  ;;  %v444_v2 = vmax.f32 %v442_v60, %v439_v58  ;;  %v457_v6 = vmax.f32 %v455_v63, %v452_v61 }
  0xa2   : > { %381 = vst.msk [vmem:[#allocation2 + $0x10] sm:$0xff] %vm286_vm0, %v379_v54  ;;  %v474_v60 = vlaneseq }
  0xa3   : > { %368 = vst.msk [vmem:[#allocation2] sm:$0xff] %vm286_vm0, %v366_v55 }
  0xa4   : > { %394 = vst.msk [vmem:[#allocation2 + $0x20] sm:$0xff] %vm286_vm0, %v392_v56  ;;  %v475_v63 = vand.u32 127, %v474_v60 }
  0xa5   : > { %v360_v3 = vld [vmem:[#allocation3 + $0x8] sm:$0xff]  ;;  %407 = vst.msk [vmem:[#allocation2 + $0x30] sm:$0xff] %vm286_vm0, %v405_v59 }
  0xa6   : > { %v375_v7 = vadd.f32 %v800_v33, %v360_v3  ;;  %v363_v8 = vadd.f32 %v799_v32, %v360_v3  ;;  %v401_v9 = vadd.f32 %v802_v35, %v360_v3  ;;  %v388_v10 = vadd.f32 %v801_v34, %v360_v3  ;;  %433 = vst.msk [vmem:[#allocation2 + $0x50] sm:$0xff] %vm286_vm0, %v431_v62 }
  0xa7   : > { %v414_v12 = vadd.f32 %v803_v37, %v360_v3  ;;  %420 = vst.msk [vmem:[#allocation2 + $0x40] sm:$0xff] %vm286_vm0, %v418_v0  ;;  %v440_v14 = vadd.f32 %v805_v39, %v360_v3  ;;  %v427_v19 = vadd.f32 %v804_v38, %v360_v3  ;;  %v453_v23 = vadd.f32 %v806_v40, %v360_v3 }
  0xa8   : > { %v380_v15 = vmax.f32 %v378_v1, %v375_v7  ;;  %v367_v16 = vmax.f32 %v365_v4, %v363_v8  ;;  %v406_v17 = vmax.f32 %v404_v5, %v401_v9  ;;  %446 = vst.msk [vmem:[#allocation2 + $0x60] sm:$0xff] %vm286_vm0, %v444_v2  ;;  %v393_v21 = vmax.f32 %v391_v11, %v388_v10 }
  0xa9   : > { %v484_v20 = vld [vmem:[#allocation2 + $0x10] sm:$0xff]  ;;  %459 = vst.msk [vmem:[#allocation2 + $0x70] sm:$0xff] %vm286_vm0, %v457_v6  ;;  %v419_v26 = vmax.f32 %v417_v13, %v414_v12  ;;  %v445_v29 = vmax.f32 %v443_v18, %v440_v14  ;;  %v432_v30 = vmax.f32 %v430_v22, %v427_v19  ;;  %v458_v31 = vmax.f32 %v456_v27, %v453_v23 }
  0xaa   : > { %v486_v24 = vsel %vm286_vm0, %v484_v20, -inf  ;;  %v464_v25 = vld [vmem:[#allocation2] sm:$0xff]  ;;  %382 = vst.msk [vmem:[#allocation2 + $0x18] sm:$0xff] %vm286_vm0, %v380_v15  ;;  %v477_v0 = vadd.s32 4294967288, %v475_v63 }
  0xab   : > { %487 = vmax.xlane.f32.xlu2 %v486_v24  ;;  %v466_v28 = vsel %vm286_vm0, %v464_v25, -inf  ;;  %369 = vst.msk [vmem:[#allocation2 + $0x8] sm:$0xff] %vm286_vm0, %v367_v16  ;;  %v499_v32 = vld [vmem:[#allocation2 + $0x20] sm:$0xff] }
  0xac   : > { %467 = vmax.xlane.f32.xlu0 %v466_v28  ;;  %408 = vst.msk [vmem:[#allocation2 + $0x38] sm:$0xff] %vm286_vm0, %v406_v17  ;;  %v501_v36 = vsel %vm286_vm0, %v499_v32, -inf  ;;  %v514_v38 = vld [vmem:[#allocation2 + $0x30] sm:$0xff] }
  0xad   : > { %395 = vst.msk [vmem:[#allocation2 + $0x28] sm:$0xff] %vm286_vm0, %v393_v21  ;;  %v516_v41 = vsel %vm286_vm0, %v514_v38, -inf  ;;  %v544_v45 = vld [vmem:[#allocation2 + $0x50] sm:$0xff] }
  0xae   : > { %421 = vst.msk [vmem:[#allocation2 + $0x48] sm:$0xff] %vm286_vm0, %v419_v26  ;;  %v529_v46 = vld [vmem:[#allocation2 + $0x40] sm:$0xff]  ;;  %v546_v48 = vsel %vm286_vm0, %v544_v45, -inf }
  0xaf   : > { %447 = vst.msk [vmem:[#allocation2 + $0x68] sm:$0xff] %vm286_vm0, %v445_v29  ;;  %v531_v49 = vsel %vm286_vm0, %v529_v46, -inf  ;;  %v559_v50 = vld [vmem:[#allocation2 + $0x60] sm:$0xff] }
  0xb0   : > { %434 = vst.msk [vmem:[#allocation2 + $0x58] sm:$0xff] %vm286_vm0, %v432_v30  ;;  %v561_v53 = vsel %vm286_vm0, %v559_v50, -inf  ;;  %v574_v57 = vld [vmem:[#allocation2 + $0x70] sm:$0xff] }
  0xb1   : > { %v485_v33 = vld [vmem:[#allocation2 + $0x18] sm:$0xff]  ;;  %460 = vst.msk [vmem:[#allocation2 + $0x78] sm:$0xff] %vm286_vm0, %v458_v31  ;;  %v576_v59 = vsel %vm286_vm0, %v574_v57, -inf }
  0xb2   : > { %v489_v34 = vsel %vm286_vm0, %v485_v33, -inf  ;;  %v465_v35 = vld [vmem:[#allocation2 + $0x8] sm:$0xff] }
  0xb3   : > { %490 = vmax.xlane.f32.xlu2 %v489_v34  ;;  %v469_v37 = vsel %vm286_vm0, %v465_v35, -inf  ;;  %v515_v39 = vld [vmem:[#allocation2 + $0x38] sm:$0xff] }
  0xb4   : > { %502 = vmax.xlane.f32.xlu0 %v501_v36  ;;  %470 = vmax.xlane.f32.xlu1 %v469_v37  ;;  %v500_v40 = vld [vmem:[#allocation2 + $0x28] sm:$0xff]  ;;  %v519_v42 = vsel %vm286_vm0, %v515_v39, -inf }
  0xb5   : > { %v504_v43 = vsel %vm286_vm0, %v500_v40, -inf  ;;  %v530_v44 = vld [vmem:[#allocation2 + $0x48] sm:$0xff] }
  0xb6   : > { %v534_v47 = vsel %vm286_vm0, %v530_v44, -inf  ;;  %v560_v51 = vld [vmem:[#allocation2 + $0x68] sm:$0xff] }
  0xb7   : > { %v545_v52 = vld [vmem:[#allocation2 + $0x58] sm:$0xff]  ;;  %v564_v54 = vsel %vm286_vm0, %v560_v51, -inf }
  0xb8   : > { %v549_v55 = vsel %vm286_vm0, %v545_v52, -inf  ;;  %v575_v56 = vld [vmem:[#allocation2 + $0x78] sm:$0xff] }
  0xb9   : > { %v579_v58 = vsel %vm286_vm0, %v575_v56, -inf }
  0xbb   : > { %517 = vmax.xlane.f32.xlu2 %v516_v41 }
  0xbc   : > { %520 = vmax.xlane.f32.xlu0 %v519_v42  ;;  %505 = vmax.xlane.f32.xlu1 %v504_v43 }
  0xc3   : > { %535 = vmax.xlane.f32.xlu2 %v534_v47 }
  0xc4   : > { %547 = vmax.xlane.f32.xlu0 %v546_v48  ;;  %532 = vmax.xlane.f32.xlu1 %v531_v49 }
  0xcb   : > { %562 = vmax.xlane.f32.xlu2 %v561_v53 }
  0xcc   : > { %565 = vmax.xlane.f32.xlu0 %v564_v54  ;;  %550 = vmax.xlane.f32.xlu1 %v549_v55 }
  0xd3   : > { %580 = vmax.xlane.f32.xlu2 %v579_v58 }
  0xd4   : > { %577 = vmax.xlane.f32.xlu1 %v576_v59 }
 0x11e   : > { %v488_v61 = vpop.xlane.xlu2 %487 }
 0x11f   : > { %v468_v62 = vpop.xlane.xlu0 %467  ;;  %v494_v2 = vperm.slane %v488_v61, %v475_v63 }
 0x120   : > { %v476_v6 = vperm.slane %v468_v62, %v475_v63 }
 0x126   : > { %v491_v1 = vpop.xlane.xlu2 %490 }
 0x127   : > { %v495_v3 = vperm.slane %v491_v1, %v477_v0  ;;  %v471_v4 = vpop.xlane.xlu1 %470  ;;  %v503_v5 = vpop.xlane.xlu0 %502 }
 0x128   : > { %v478_v7 = vperm.slane %v471_v4, %v477_v0  ;;  %v509_v14 = vperm.slane %v503_v5, %v475_v63 }
 0x129   : > { %v496_v8 = vsel %vm479_vm3, %v495_v3, %v494_v2 }
 0x12a   : > { %498 = vst.msk [vmem:[%s1046_s21 + $0x1] sm:$0x1] %vm482_vm4, %v496_v8  ;;  %v480_v9 = vsel %vm479_vm3, %v478_v7, %v476_v6 }
 0x12b   : > { %483 = vst.msk [vmem:[%s1046_s21] sm:$0x1] %vm482_vm4, %v480_v9 }
 0x12e   : > { %v518_v10 = vpop.xlane.xlu2 %517 }
 0x12f   : > { %v524_v11 = vperm.slane %v518_v10, %v475_v63  ;;  %v506_v12 = vpop.xlane.xlu1 %505  ;;  %v521_v13 = vpop.xlane.xlu0 %520 }
 0x130   : > { %v510_v15 = vperm.slane %v506_v12, %v477_v0  ;;  %v525_v16 = vperm.slane %v521_v13, %v477_v0 }
 0x132   : > { %v511_v17 = vsel %vm479_vm3, %v510_v15, %v509_v14  ;;  %v526_v18 = vsel %vm479_vm3, %v525_v16, %v524_v11 }
 0x133   : > { %513 = vst.msk [vmem:[%s1046_s21 + $0x2] sm:$0x1] %vm482_vm4, %v511_v17 }
 0x134   : > { %528 = vst.msk [vmem:[%s1046_s21 + $0x3] sm:$0x1] %vm482_vm4, %v526_v18 }
 0x136   : > { %v536_v19 = vpop.xlane.xlu2 %535 }
 0x137   : > { %v540_v20 = vperm.slane %v536_v19, %v477_v0  ;;  %v533_v21 = vpop.xlane.xlu1 %532  ;;  %v548_v22 = vpop.xlane.xlu0 %547 }
 0x138   : > { %v539_v23 = vperm.slane %v533_v21, %v475_v63  ;;  %v554_v29 = vperm.slane %v548_v22, %v475_v63 }
 0x13a   : > { %v541_v24 = vsel %vm479_vm3, %v540_v20, %v539_v23 }
 0x13b   : > { %543 = vst.msk [vmem:[%s1046_s21 + $0x4] sm:$0x1] %vm482_vm4, %v541_v24 }
 0x13e   : > { %v563_v25 = vpop.xlane.xlu2 %562 }
 0x13f   : > { %v569_v26 = vperm.slane %v563_v25, %v475_v63  ;;  %v551_v27 = vpop.xlane.xlu1 %550  ;;  %v566_v28 = vpop.xlane.xlu0 %565 }
 0x140   : > { %v555_v30 = vperm.slane %v551_v27, %v477_v0  ;;  %v570_v31 = vperm.slane %v566_v28, %v477_v0 }
 0x142   : > { %v556_v32 = vsel %vm479_vm3, %v555_v30, %v554_v29  ;;  %v571_v33 = vsel %vm479_vm3, %v570_v31, %v569_v26 }
 0x143   : > { %558 = vst.msk [vmem:[%s1046_s21 + $0x5] sm:$0x1] %vm482_vm4, %v556_v32 }
 0x144   : > { %573 = vst.msk [vmem:[%s1046_s21 + $0x6] sm:$0x1] %vm482_vm4, %v571_v33 }
 0x146   : > { %v581_v34 = vpop.xlane.xlu2 %580 }
 0x147   : > { %v585_v35 = vperm.slane %v581_v34, %v477_v0  ;;  %v578_v36 = vpop.xlane.xlu1 %577 }
 0x148   : > { %v584_v37 = vperm.slane %v578_v36, %v475_v63 }
 0x14a   : > { %v586_v38 = vsel %vm479_vm3, %v585_v35, %v584_v37 }
 0x14b   : > { %588 = vst.msk [vmem:[%s1046_s21 + $0x7] sm:$0x1] %vm482_vm4, %v586_v38 }
 0x14c   : > { %834 = shalt.err (!%p831_p5)
}
 0x14d   : > { %736 = dma.vmem_to_hbm [thread:$0]  (%p951_p4), %s605_s29, 128, %s607_s30, %s590_s15  }
 0x14e PF: > { %p742_p6 = scmp.ge.s32.totalorder %s885_s17, 2  ;;  %s618_s11 = sand.u32 1, %s865_s12  }
 0x14f   : > { %s619_s18 = scalar_lea.sflag [#allocation5], %s618_s11 }
 0x150   : > { %p739_p7 = pnand %p742_p6, %p958_p8 }
 0x152   : > { %p740_p9 = pneg %p739_p7 }
 0x154   : > { %860 = dma.done.wait (%p740_p9), %s619_s18, 128  }
 0x155   : > { %862 = vsyncadd (%p740_p9), %s619_s18, 4294967168  ;;  %s16_s17 = sadd.s32 1, %s885_s17   ;;  %s1116_s12 = smov %s869_s13 }
 0x156   : > { %p13_p10 = scmp.ge.s32.totalorder %s16_s17, 4   ;;  %s1117_s13 = smov %s873_s14 }
 0x157   : > { %s1118_s14 = smov %s964_s25  ;;  %s1119_s15 = smov %s881_s16 }
 0x158   : > { %s1120_s16 = smov %s1122_s20  ;;  %15 = sbr.rel (!%p13_p10) target bundleno = 4 (0x4), region = 88 }
 0x15d   :  { %625 = vsyncpa [#allocation5], 1 }
 0x15e   :  { %627 = vsyncpa [#allocation5 + $0x1], 1 }

</bundles_post_ra>
